<compile_context>
chip_gen: v6e
topology: v6e:2x2x1
jax: 0.10.0
libtpu: 0.0.40
codegen_flags: <defaults>
</compile_context>

<pallas_src>
import functools

import jax
import jax.numpy as jnp
from jax.experimental import pallas as pl
from jax.experimental.pallas import tpu as pltpu

LANE = 128
SUBLANE = 8


def _round_up(x, m):
    return (x + m - 1) // m * m


def _dueling_kernel(
    n_real,       # python int: real batch rows (rest are zero padding)
    n_actions,    # python int: real action columns in the fused head output
    x_ref,        # (Np, Kp)    zero-padded flattened input patch
    wc_ref,       # (Kp, Cp)    conv weight as matmul, zero-padded, (in, out)
    bc_ref,       # (1, Cp)     conv bias (f32)
    w1_ref,       # (Cp, Cp)    linear1 weight, zero-padded, (in, out)
    b1_ref,       # (1, Cp)     linear1 bias (f32)
    wh_ref,       # (Cp, 128)   fused [advantage | value | 0-pad] head weight
    bh_ref,       # (1, 128)    fused head bias (f32)
    q_ref,        # (Np, 128)   lane-dense output slab; Q lives in cols [0:A)
):
    # conv (1x1 spatial output) == matmul over flattened K*K patch
    h = jnp.dot(x_ref[...], wc_ref[...], preferred_element_type=jnp.float32)
    h = h + bc_ref[...]

    # linear1 + ReLU
    h = jnp.dot(h, w1_ref[...], preferred_element_type=jnp.float32) + b1_ref[...]
    h = jnp.maximum(h, 0.0)

    # fused advantage/value heads in ONE lane-dense matmul:
    #   heads[:, 0:A)  = advantages,  heads[:, A] = value,  rest = 0
    heads = jnp.dot(h, wh_ref[...], preferred_element_type=jnp.float32)
    heads = heads + bh_ref[...]

    # advantages.mean(): scalar mean over ALL real (batch, action) elements,
    # exactly as torch's advantages.mean().  Mask out padded rows/cols so the
    # zero padding does not bias the mean; use a baked 1/(N*A) instead of div.
    row_ids = jax.lax.broadcasted_iota(jnp.int32, heads.shape, 0)
    col_ids = jax.lax.broadcasted_iota(jnp.int32, heads.shape, 1)
    adv_mask = (row_ids < n_real) & (col_ids < n_actions)
    adv_sum = jnp.sum(jnp.where(adv_mask, heads, 0.0))
    adv_mean = adv_sum * (1.0 / float(n_real * n_actions))

    # dueling combine: q = V + (A - mean(A)).  Computed over the full padded
    # slab so the store is a full-width unmasked vst; only cols [0:A) of the
    # real rows are meaningful and the wrapper slices them out.
    val = heads[:, n_actions:n_actions + 1]          # (Np, 1), broadcasts over lanes
    q_ref[...] = (val + (heads - adv_mean)).astype(q_ref.dtype)


def dueling_net_forward(state, params, *, compute_dtype=jnp.float32):
    """state: (N, 1, K, K) float32 (NCHW). Returns qvals: (N, actions_space).

    compute_dtype: dtype fed to the MXU (jnp.bfloat16 recommended on v6e/v7x
    at scale; accumulation stays f32).  Biases and epilogue math stay f32
    (v5e has no bf16 VPU).
    """
    n, cin, kh, kw = state.shape
    assert cin == 1
    wc, bc, w1, b1, wa, ba, wv, bv = (
        params["conv_w"], params["conv_b"],
        params["lin1_w"], params["lin1_b"],
        params["lina_w"], params["lina_b"],
        params["linv_w"], params["linv_b"],
    )
    c = wc.shape[0]           # out_channels
    a = wa.shape[0]           # actions_space
    assert wc.shape == (c, 1, kh, kw), "kernel_size must equal input spatial size"
    assert a + 1 <= LANE, "fused adv|val head must fit in one 128-lane tile"

    kk = kh * kw
    n_pad = max(_round_up(n, SUBLANE), SUBLANE)
    kk_pad = _round_up(kk, LANE)
    c_pad = _round_up(c, LANE)

    def pad2(m, rows, cols):
        return jnp.pad(m, ((0, rows - m.shape[0]), (0, cols - m.shape[1])))

    # Glue (wrapper-side only): flatten patch, pre-transpose weights to
    # (in, out), zero-pad every dim to native tiles, fuse the two heads.
    x2d = pad2(state.reshape(n, kk), n_pad, kk_pad).astype(compute_dtype)
    wc_t = pad2(wc.reshape(c, kk).T, kk_pad, c_pad).astype(compute_dtype)   # (Kp, Cp)
    w1_t = pad2(w1.T, c_pad, c_pad).astype(compute_dtype)                   # (Cp, Cp)
    wh_t = pad2(jnp.concatenate([wa.T, wv.T], axis=1),                      # (Cp, 128)
                c_pad, LANE).astype(compute_dtype)
    bc2 = pad2(bc.reshape(1, c).astype(jnp.float32), 1, c_pad)
    b12 = pad2(b1.reshape(1, c).astype(jnp.float32), 1, c_pad)
    bh2 = pad2(jnp.concatenate([ba, bv]).reshape(1, a + 1).astype(jnp.float32),
               1, LANE)

    in_bytes = (
        (x2d.size + wc_t.size + w1_t.size + wh_t.size) * x2d.dtype.itemsize
        + (bc2.size + b12.size + bh2.size) * 4
    )
    out_bytes = n_pad * LANE * 4
    cost = pl.CostEstimate(
        flops=2 * n_pad * (kk_pad * c_pad + c_pad * c_pad + c_pad * LANE),
        transcendentals=0,
        bytes_accessed=in_bytes + out_bytes,
    )

    vmem = pl.BlockSpec(memory_space=pltpu.MemorySpace.VMEM)
    q_pad = pl.pallas_call(
        functools.partial(_dueling_kernel, n, a),
        out_shape=jax.ShapeDtypeStruct((n_pad, LANE), jnp.float32),
        in_specs=[vmem] * 7,
        out_specs=vmem,
        cost_estimate=cost,
    )(x2d, wc_t, bc2, w1_t, b12, wh_t, bh2)

    return q_pad[:n, :a]


def init_params(key, out_channels, kernel_size, actions_space):
    """Deterministic synthetic parameters (shapes match nn.Module __init__)."""
    ks = jax.random.split(key, 8)

    def u(k, shape, fan_in):
        bound = 1.0 / jnp.sqrt(fan_in)
        return jax.random.uniform(k, shape, jnp.float32, -bound, bound)

    kk = kernel_size * kernel_size
    return {
        "conv_w": u(ks[0], (out_channels, 1, kernel_size, kernel_size), kk),
        "conv_b": u(ks[1], (out_channels,), kk),
        "lin1_w": u(ks[2], (out_channels, out_channels), out_channels),
        "lin1_b": u(ks[3], (out_channels,), out_channels),
        "lina_w": u(ks[4], (actions_space, out_channels), out_channels),
        "lina_b": u(ks[5], (actions_space,), out_channels),
        "linv_w": u(ks[6], (1, out_channels), out_channels),
        "linv_b": u(ks[7], (1,), out_channels),
    }


def _reference_forward(state, params):
    """Pure-JAX reference mirroring the PyTorch forward."""
    n = state.shape[0]
    c = params["conv_w"].shape[0]
    x = state.reshape(n, -1) @ params["conv_w"].reshape(c, -1).T + params["conv_b"]
    x = x @ params["lin1_w"].T + params["lin1_b"]
    x = jnp.maximum(x, 0.0)
    adv = x @ params["lina_w"].T + params["lina_b"]
    val = x @ params["linv_w"].T + params["linv_b"]
    return val + (adv - adv.mean())


if __name__ == "__main__":
    # Small shapes consistent with the module: the conv output must be 1x1
    # spatially for .view(-1, out_channels) to be a per-sample feature vector.
    batch = 2
    kernel_size = 8          # == input spatial size
    out_channels = 32
    actions_space = 4

    key = jax.random.PRNGKey(0)
    k_state, k_params = jax.random.split(key)
    state = jax.random.normal(
        k_state, (batch, 1, kernel_size, kernel_size), jnp.float32)
    params = init_params(k_params, out_channels, kernel_size, actions_space)

    qvals = dueling_net_forward(state, params)
    qvals = jax.block_until_ready(qvals)

    ref = _reference_forward(state, params)
    assert qvals.shape == (batch, actions_space)
    assert jnp.allclose(qvals, ref, atol=1e-4, rtol=1e-4)
    print("KERNEL_OK")
</pallas_src>

<mosaic_0001>
module attributes {stable_mosaic.version = 11 : i64} {
  func.func @_dueling_kernel(%arg0: memref<8x128xf32, #tpu.memory_space<vmem>>, %arg1: memref<128x128xf32, #tpu.memory_space<vmem>>, %arg2: memref<1x128xf32, #tpu.memory_space<vmem>>, %arg3: memref<128x128xf32, #tpu.memory_space<vmem>>, %arg4: memref<1x128xf32, #tpu.memory_space<vmem>>, %arg5: memref<128x128xf32, #tpu.memory_space<vmem>>, %arg6: memref<1x128xf32, #tpu.memory_space<vmem>>, %arg7: memref<8x128xf32, #tpu.memory_space<vmem>>) attributes {dimension_semantics = [], scalar_prefetch = 0 : i64, scratch_operands = 0 : i64, tpu.core_type = #tpu.core_type<tc>} {
    %c0 = arith.constant 0 : index
    %c0_0 = arith.constant 0 : index
    %0 = vector.load %arg0[%c0, %c0_0] : memref<8x128xf32, #tpu.memory_space<vmem>>, vector<8x128xf32>
    %c0_1 = arith.constant 0 : index
    %c0_2 = arith.constant 0 : index
    %1 = vector.load %arg1[%c0_1, %c0_2] : memref<128x128xf32, #tpu.memory_space<vmem>>, vector<128x128xf32>
    %cst = arith.constant dense<0.000000e+00> : vector<8x128xf32>
    %2 = tpu.matmul %0, %1, %cst {dimension_numbers = #tpu.dot_dimension_numbers<[1], [0], [0], [1], [0, 0, 1, 1], [], []>} : vector<8x128xf32>, vector<128x128xf32>, vector<8x128xf32> -> vector<8x128xf32>
    %c0_3 = arith.constant 0 : index
    %c0_4 = arith.constant 0 : index
    %3 = vector.load %arg2[%c0_3, %c0_4] : memref<1x128xf32, #tpu.memory_space<vmem>>, vector<1x128xf32>
    %4 = vector.broadcast %3 : vector<1x128xf32> to vector<8x128xf32>
    %5 = arith.addf %2, %4 : vector<8x128xf32>
    %c0_5 = arith.constant 0 : index
    %c0_6 = arith.constant 0 : index
    %6 = vector.load %arg3[%c0_5, %c0_6] : memref<128x128xf32, #tpu.memory_space<vmem>>, vector<128x128xf32>
    %cst_7 = arith.constant dense<0.000000e+00> : vector<8x128xf32>
    %7 = tpu.matmul %5, %6, %cst_7 {dimension_numbers = #tpu.dot_dimension_numbers<[1], [0], [0], [1], [0, 0, 1, 1], [], []>} : vector<8x128xf32>, vector<128x128xf32>, vector<8x128xf32> -> vector<8x128xf32>
    %c0_8 = arith.constant 0 : index
    %c0_9 = arith.constant 0 : index
    %8 = vector.load %arg4[%c0_8, %c0_9] : memref<1x128xf32, #tpu.memory_space<vmem>>, vector<1x128xf32>
    %9 = vector.broadcast %8 : vector<1x128xf32> to vector<8x128xf32>
    %10 = arith.addf %7, %9 : vector<8x128xf32>
    %cst_10 = arith.constant 0.000000e+00 : f32
    %11 = vector.broadcast %cst_10 : f32 to vector<8x128xf32>
    %12 = arith.maximumf %10, %11 : vector<8x128xf32>
    %c0_11 = arith.constant 0 : index
    %c0_12 = arith.constant 0 : index
    %13 = vector.load %arg5[%c0_11, %c0_12] : memref<128x128xf32, #tpu.memory_space<vmem>>, vector<128x128xf32>
    %cst_13 = arith.constant dense<0.000000e+00> : vector<8x128xf32>
    %14 = tpu.matmul %12, %13, %cst_13 {dimension_numbers = #tpu.dot_dimension_numbers<[1], [0], [0], [1], [0, 0, 1, 1], [], []>} : vector<8x128xf32>, vector<128x128xf32>, vector<8x128xf32> -> vector<8x128xf32>
    %c0_14 = arith.constant 0 : index
    %c0_15 = arith.constant 0 : index
    %15 = vector.load %arg6[%c0_14, %c0_15] : memref<1x128xf32, #tpu.memory_space<vmem>>, vector<1x128xf32>
    %16 = vector.broadcast %15 : vector<1x128xf32> to vector<8x128xf32>
    %17 = arith.addf %14, %16 : vector<8x128xf32>
    %18 = tpu.iota {dimensions = array<i32: 0>} : vector<8x128xi32>
    %19 = tpu.iota {dimensions = array<i32: 1>} : vector<8x128xi32>
    %c2_i32 = arith.constant 2 : i32
    %20 = vector.broadcast %c2_i32 : i32 to vector<8x128xi32>
    %21 = arith.cmpi slt, %18, %20 : vector<8x128xi32>
    %c4_i32 = arith.constant 4 : i32
    %22 = vector.broadcast %c4_i32 : i32 to vector<8x128xi32>
    %23 = arith.cmpi slt, %19, %22 : vector<8x128xi32>
    %24 = arith.andi %21, %23 : vector<8x128xi1>
    %cst_16 = arith.constant 0.000000e+00 : f32
    %25 = vector.broadcast %cst_16 : f32 to vector<8x128xf32>
    %26 = arith.select %24, %17, %25 : vector<8x128xi1>, vector<8x128xf32>
    %27 = vector.shape_cast %26 : vector<8x128xf32> to vector<1x8x128xf32>
    %cst_17 = arith.constant dense<0.000000e+00> : vector<1xf32>
    %28 = vector.multi_reduction <add>, %27, %cst_17 [1, 2] : vector<1x8x128xf32> to vector<1xf32>
    %29 = vector.shape_cast %28 : vector<1xf32> to vector<1x1x1xf32>
    %30 = vector.extract %29[0, 0, 0] : f32 from vector<1x1x1xf32>
    %cst_18 = arith.constant 1.250000e-01 : f32
    %31 = arith.mulf %30, %cst_18 : f32
    %32 = vector.extract_strided_slice %17 {offsets = [0, 4], sizes = [8, 1], strides = [1, 1]} : vector<8x128xf32> to vector<8x1xf32>
    %33 = vector.broadcast %31 : f32 to vector<8x128xf32>
    %34 = arith.subf %17, %33 : vector<8x128xf32>
    %35 = vector.broadcast %32 : vector<8x1xf32> to vector<8x128xf32>
    %36 = arith.addf %35, %34 : vector<8x128xf32>
    %c0_19 = arith.constant 0 : index
    %c0_20 = arith.constant 0 : index
    %37 = vector.load %arg7[%c0_19, %c0_20] : memref<8x128xf32, #tpu.memory_space<vmem>>, vector<8x128xf32>
    tpu.vector_store %arg7[%c0_19, %c0_20], %36 {strides = array<i32>} : memref<8x128xf32, #tpu.memory_space<vmem>>, vector<8x128xf32>,
    return
  }
}

</mosaic_0001>

<bundles_post_ra>
// kernel: tpu_custom_call.1
= control target key start
LH: loop header
LB: loop body
LE: loop exit
PB: predicated region body
PF: predicated region fallthrough
CT: control target
= control target key end

     0   :  { %12 = vsyncpa [#allocation3], 0  ;;  %s822_s0 = inlined_call_operand.hbm [shape: f32[8,128], index: 0, kind: input, shape index: {}]   ;;  %s823_s1 = inlined_call_operand.hbm [shape: f32[128,128], index: 1, kind: input, shape index: {}]   ;;  %s824_s2 = inlined_call_operand.vmem [shape: f32[1,128], index: 2, kind: input, shape index: {}]   ;;  %s825_s3 = inlined_call_operand.hbm [shape: f32[128,128], index: 3, kind: input, shape index: {}]   ;;  %s826_s4 = inlined_call_operand.vmem [shape: f32[1,128], index: 4, kind: input, shape index: {}]   ;;  %s827_s5 = inlined_call_operand.hbm [shape: f32[128,128], index: 5, kind: input, shape index: {}]   ;;  %s828_s6 = inlined_call_operand.vmem [shape: f32[1,128], index: 6, kind: input, shape index: {}]   ;;  %s829_s7 = inlined_call_operand.hbm [shape: f32[8,128], index: 7, kind: output, shape index: {}]  }
   0x1   :  { %13 = vsyncpa [#allocation6], 0 }
   0x2   :  { %14 = vsyncpa [#allocation9], 0 }
   0x3   :  { %15 = vsyncpa [#allocation4], 0  ;;  %s685_s24 = smov [#allocation5]  }
   0x4   :  { %s31_s25 = sshll.u32 %s685_s24, 4  ;;  %s32_s25 = int_to_ptr.vmem [resolvable:$true] %s31_s25 }
   0x5   :  { %s585_s26 = scalar_lea.vmem %s32_s25, 2048  ;;  %p590_p1 = scmp.lt.s32.totalorder %s32_s25, %s32_s25 }
   0x6   :  { %p586_p0 = scmp.ne.s32.totalorder %s32_s25, %s585_s26  ;;  %p591_p2 = scmp.lt.s32.totalorder %s585_s26, %s585_s26 }
   0x8   :  { %p592_p3 = por %p591_p2, %p590_p1 }
   0xa   :  { %p593_p4 = pnand %p592_p3, %p586_p0 }
   0xc   :  { %596 = shalt.err (!%p593_p4)
}
   0xd   :  { %s686_s27 = smov 128   ;;  %s687_s28 = smov 8  }
   0xe   :  { %37 = dma.hbm_to_vmem [thread:$0]  %s823_s1, 2048, %s32_s25, [#allocation6], %s686_s27, %s686_s27, %s687_s28  }
   0xf   :  { %s688_s8 = smov [#allocation2]   ;;  %s689_s10 = smov [#allocation7]  }
  0x10   :  { %s22_s9 = sshll.u32 %s688_s8, 4  ;;  %s45_s11 = sshll.u32 %s689_s10, 4  ;;  %s23_s9 = int_to_ptr.vmem [resolvable:$true] %s22_s9  ;;  %s46_s11 = int_to_ptr.vmem [resolvable:$true] %s45_s11 }
  0x11   :  { %s605_s12 = scalar_lea.vmem %s23_s9, 128  ;;  %p610_p6 = scmp.lt.s32.totalorder %s23_s9, %s23_s9 }
  0x12   :  { %p606_p5 = scmp.ne.s32.totalorder %s23_s9, %s605_s12  ;;  %p611_p7 = scmp.lt.s32.totalorder %s605_s12, %s605_s12 }
  0x14   :  { %p612_p8 = por %p611_p7, %p610_p6 }
  0x16   :  { %p613_p9 = pnand %p612_p8, %p606_p5 }
  0x18   :  { %616 = shalt.err (!%p613_p9)
}
  0x19   :  { %25 = dma.hbm_to_vmem [thread:$0]  %s822_s0, 128, %s23_s9, [#allocation3]  }
  0x1a   :  { %s625_s15 = scalar_lea.vmem %s46_s11, 2048  ;;  %p630_p11 = scmp.lt.s32.totalorder %s46_s11, %s46_s11 }
  0x1b   :  { %p626_p10 = scmp.ne.s32.totalorder %s46_s11, %s625_s15  ;;  %p631_p12 = scmp.lt.s32.totalorder %s625_s15, %s625_s15 }
  0x1d   :  { %p632_p13 = por %p631_p12, %p630_p11 }
  0x1f   :  { %p633_p0 = pnand %p632_p13, %p626_p10 }
  0x21   :  { %636 = shalt.err (!%p633_p0)
}
  0x22   :  { %51 = dma.hbm_to_vmem [thread:$0]  %s825_s3, 2048, %s46_s11, [#allocation6], %s686_s27, %s686_s27, %s687_s28  }
  0x23   :  { %s690_s17 = smov [#allocation8]  }
  0x24   :  { %s59_s18 = sshll.u32 %s690_s17, 4  ;;  %s60_s18 = int_to_ptr.vmem [resolvable:$true] %s59_s18 }
  0x25   :  { %s645_s19 = scalar_lea.vmem %s60_s18, 2048  ;;  %p650_p2 = scmp.lt.s32.totalorder %s60_s18, %s60_s18 }
  0x26   :  { %p646_p1 = scmp.ne.s32.totalorder %s60_s18, %s645_s19  ;;  %p651_p3 = scmp.lt.s32.totalorder %s645_s19, %s645_s19 }
  0x28   :  { %p652_p4 = por %p651_p3, %p650_p2 }
  0x2a   :  { %p653_p5 = pnand %p652_p4, %p646_p1 }
  0x2c   :  { %656 = shalt.err (!%p653_p5)
}
  0x2d   :  { %65 = dma.hbm_to_vmem [thread:$0]  %s827_s5, 2048, %s60_s18, [#allocation9], %s686_s27, %s686_s27, %s687_s28  }
  0x2e   :  { %677 = dma.done.wait [#allocation3], 128  }
  0x2f   :  { %678 = vsyncadd [#allocation3], 4294967168 }
  0x30   :  { %679 = dma.done.wait [#allocation6], 4096  }
  0x31   :  { %680 = vsyncadd [#allocation6], 4294963200 }
  0x32   :  { %681 = dma.done.wait [#allocation9], 2048  }
  0x33   :  { %682 = vsyncadd [#allocation9], 4294965248  ;;  %v691_v0 = vmov 0.0   ;;  %vm692_vm0 = vmmov 0   ;;  %v96_v1 = vld [vmem:[#allocation5 + $0x78] sm:$0xff]  ;;  %v95_v2 = vld [vmem:[#allocation5 + $0x70] sm:$0xff]  ;;  %v361_v60 = vlaneseq }
  0x34   :  { %459 = vmatprep.subr.mxu0 %v691_v0  ;;  %491 = vmatprep.mubr.msk.f32.mxu0 %vm692_vm0, %v691_v0  ;;  %v94_v3 = vld [vmem:[#allocation5 + $0x68] sm:$0xff]  ;;  %v93_v4 = vld [vmem:[#allocation5 + $0x60] sm:$0xff]  ;;  %v189_v5 = vld [vmem:[#allocation7 + $0x78] sm:$0xff]  ;;  %v693_v59 = vmov 4   ;;  %s694_s25 = smov [#allocation10]  }
  0x35   :  { %494 = vmatprep.subr.mxu1 %v691_v0  ;;  %526 = vmatprep.mubr.msk.f32.mxu1 %vm692_vm0, %v691_v0  ;;  %v92_v6 = vld [vmem:[#allocation5 + $0x58] sm:$0xff]  ;;  %v188_v7 = vld [vmem:[#allocation7 + $0x70] sm:$0xff]  ;;  %v187_v8 = vld [vmem:[#allocation7 + $0x68] sm:$0xff]  ;;  %v362_v61 = vshrl.u32 %v361_v60, 7  ;;  %v364_v62 = vand.u32 127, %v361_v60 }
  0x36   :  { %460 = vmatpush3.msra.mxu0 %v96_v1  ;;  %495 = vmatpush3.msra.mxu1 %v189_v5  ;;  %v91_v9 = vld [vmem:[#allocation5 + $0x50] sm:$0xff]  ;;  %v186_v10 = vld [vmem:[#allocation7 + $0x60] sm:$0xff]  ;;  %v90_v11 = vld [vmem:[#allocation5 + $0x48] sm:$0xff] }
  0x37   :  { %461 = vmatprep.subr.mxu0 %v691_v0  ;;  %496 = vmatprep.subr.mxu1 %v691_v0  ;;  %v185_v12 = vld [vmem:[#allocation7 + $0x58] sm:$0xff]  ;;  %v89_v13 = vld [vmem:[#allocation5 + $0x40] sm:$0xff]  ;;  %v184_v14 = vld [vmem:[#allocation7 + $0x50] sm:$0xff]  ;;  %vm365_vm1 = vcmp.lt.s32.totalorder %v362_v61, 2  ;;  %vm366_vm2 = vcmp.lt.s32.totalorder %v364_v62, 4 }
  0x38   :  { %462 = vmatpush3.msra.mxu0 %v95_v2  ;;  %497 = vmatpush3.msra.mxu1 %v188_v7  ;;  %v88_v15 = vld [vmem:[#allocation5 + $0x38] sm:$0xff]  ;;  %v183_v16 = vld [vmem:[#allocation7 + $0x48] sm:$0xff]  ;;  %v87_v17 = vld [vmem:[#allocation5 + $0x30] sm:$0xff] }
  0x39   :  { %463 = vmatprep.subr.mxu0 %v691_v0  ;;  %498 = vmatprep.subr.mxu1 %v691_v0  ;;  %v182_v18 = vld [vmem:[#allocation7 + $0x40] sm:$0xff]  ;;  %v86_v19 = vld [vmem:[#allocation5 + $0x28] sm:$0xff]  ;;  %v181_v20 = vld [vmem:[#allocation7 + $0x38] sm:$0xff] }
  0x3a   :  { %464 = vmatpush3.msra.mxu0 %v94_v3  ;;  %499 = vmatpush3.msra.mxu1 %v187_v8  ;;  %v85_v21 = vld [vmem:[#allocation5 + $0x20] sm:$0xff]  ;;  %v180_v22 = vld [vmem:[#allocation7 + $0x30] sm:$0xff]  ;;  %v84_v23 = vld [vmem:[#allocation5 + $0x18] sm:$0xff] }
  0x3b   :  { %465 = vmatprep.subr.mxu0 %v691_v0  ;;  %500 = vmatprep.subr.mxu1 %v691_v0  ;;  %v179_v24 = vld [vmem:[#allocation7 + $0x28] sm:$0xff]  ;;  %v83_v25 = vld [vmem:[#allocation5 + $0x10] sm:$0xff]  ;;  %v178_v26 = vld [vmem:[#allocation7 + $0x20] sm:$0xff] }
  0x3c   :  { %466 = vmatpush3.msra.mxu0 %v93_v4  ;;  %501 = vmatpush3.msra.mxu1 %v186_v10  ;;  %v82_v27 = vld [vmem:[#allocation5 + $0x8] sm:$0xff]  ;;  %v177_v28 = vld [vmem:[#allocation7 + $0x18] sm:$0xff]  ;;  %v81_v29 = vld [vmem:[#allocation5] sm:$0xff] }
  0x3d   :  { %467 = vmatprep.subr.mxu0 %v691_v0  ;;  %502 = vmatprep.subr.mxu1 %v691_v0  ;;  %v80_v30 = vld [vmem:[#allocation2] sm:$0xff]  ;;  %v176_v31 = vld [vmem:[#allocation7 + $0x10] sm:$0xff]  ;;  %v175_v32 = vld [vmem:[#allocation7 + $0x8] sm:$0xff] }
  0x3e   :  { %468 = vmatpush3.msra.mxu0 %v92_v6  ;;  %503 = vmatpush3.msra.mxu1 %v185_v12  ;;  %v174_v33 = vld [vmem:[#allocation7] sm:$0xff]  ;;  %v283_v34 = vld [vmem:[#allocation8 + $0x78] sm:$0xff]  ;;  %v282_v35 = vld [vmem:[#allocation8 + $0x70] sm:$0xff] }
  0x3f   :  { %469 = vmatprep.subr.mxu0 %v691_v0  ;;  %504 = vmatprep.subr.mxu1 %v691_v0  ;;  %v281_v36 = vld [vmem:[#allocation8 + $0x68] sm:$0xff]  ;;  %v280_v37 = vld [vmem:[#allocation8 + $0x60] sm:$0xff]  ;;  %v279_v38 = vld [vmem:[#allocation8 + $0x58] sm:$0xff] }
  0x40   :  { %470 = vmatpush3.msra.mxu0 %v91_v9  ;;  %505 = vmatpush3.msra.mxu1 %v184_v14  ;;  %v278_v39 = vld [vmem:[#allocation8 + $0x50] sm:$0xff]  ;;  %v277_v40 = vld [vmem:[#allocation8 + $0x48] sm:$0xff]  ;;  %v276_v41 = vld [vmem:[#allocation8 + $0x40] sm:$0xff] }
  0x41   :  { %471 = vmatprep.subr.mxu0 %v691_v0  ;;  %506 = vmatprep.subr.mxu1 %v691_v0  ;;  %v275_v42 = vld [vmem:[#allocation8 + $0x38] sm:$0xff]  ;;  %v274_v43 = vld [vmem:[#allocation8 + $0x30] sm:$0xff]  ;;  %v273_v44 = vld [vmem:[#allocation8 + $0x28] sm:$0xff] }
  0x42   :  { %472 = vmatpush3.msra.mxu0 %v90_v11  ;;  %507 = vmatpush3.msra.mxu1 %v183_v16  ;;  %v272_v45 = vld [vmem:[#allocation8 + $0x20] sm:$0xff]  ;;  %v271_v46 = vld [vmem:[#allocation8 + $0x18] sm:$0xff]  ;;  %v270_v51 = vld [vmem:[#allocation8 + $0x10] sm:$0xff] }
  0x43   :  { %473 = vmatprep.subr.mxu0 %v691_v0  ;;  %508 = vmatprep.subr.mxu1 %v691_v0  ;;  %v405_v47 = vld [vmem:[%s824_s2] ss:$0 sm:$0xff]  ;;  %v269_v52 = vld [vmem:[#allocation8 + $0x8] sm:$0xff]  ;;  %v268_v53 = vld [vmem:[#allocation8] sm:$0xff] }
  0x44   :  { %474 = vmatpush3.msra.mxu0 %v89_v13  ;;  %509 = vmatpush3.msra.mxu1 %v182_v18  ;;  %v406_v54 = vld [vmem:[%s826_s4] ss:$0 sm:$0xff]  ;;  %vm367_vm3 = vmand %vm365_vm1, %vm366_vm2 }
  0x45   :  { %475 = vmatprep.subr.mxu0 %v691_v0  ;;  %510 = vmatprep.subr.mxu1 %v691_v0  ;;  %v407_v63 = vld [vmem:[%s828_s6] ss:$0 sm:$0xff]  ;;  %s394_s6 = sshll.u32 %s694_s25, 4  ;;  %s395_s6 = int_to_ptr.vmem [resolvable:$true] %s394_s6 }
  0x46   :  { %476 = vmatpush3.msra.mxu0 %v88_v15  ;;  %511 = vmatpush3.msra.mxu1 %v181_v20  ;;  %s657_s26 = scalar_lea.vmem %s395_s6, 128  ;;  %p662_p7 = scmp.lt.s32.totalorder %s395_s6, %s395_s6 }
  0x47   :  { %477 = vmatprep.subr.mxu0 %v691_v0  ;;  %512 = vmatprep.subr.mxu1 %v691_v0  ;;  %p658_p6 = scmp.ne.s32.totalorder %s395_s6, %s657_s26  ;;  %p663_p8 = scmp.lt.s32.totalorder %s657_s26, %s657_s26 }
  0x48   :  { %478 = vmatpush3.msra.mxu0 %v87_v17  ;;  %513 = vmatpush3.msra.mxu1 %v180_v22 }
  0x49   :  { %479 = vmatprep.subr.mxu0 %v691_v0  ;;  %514 = vmatprep.subr.mxu1 %v691_v0  ;;  %p664_p9 = por %p663_p8, %p662_p7 }
  0x4a   :  { %480 = vmatpush3.msra.mxu0 %v86_v19  ;;  %515 = vmatpush3.msra.mxu1 %v179_v24 }
  0x4b   :  { %481 = vmatprep.subr.mxu0 %v691_v0  ;;  %516 = vmatprep.subr.mxu1 %v691_v0  ;;  %p665_p10 = pnand %p664_p9, %p658_p6 }
  0x4c   :  { %482 = vmatpush3.msra.mxu0 %v85_v21  ;;  %517 = vmatpush3.msra.mxu1 %v178_v26 }
  0x4d   :  { %483 = vmatprep.subr.mxu0 %v691_v0  ;;  %518 = vmatprep.subr.mxu1 %v691_v0 }
  0x4e   :  { %484 = vmatpush3.msra.mxu0 %v84_v23  ;;  %519 = vmatpush3.msra.mxu1 %v177_v28 }
  0x4f   :  { %485 = vmatprep.subr.mxu0 %v691_v0  ;;  %520 = vmatprep.subr.mxu1 %v691_v0 }
  0x50   :  { %486 = vmatpush3.msra.mxu0 %v83_v25  ;;  %521 = vmatpush3.msra.mxu1 %v176_v31 }
  0x51   :  { %487 = vmatprep.subr.mxu0 %v691_v0  ;;  %522 = vmatprep.subr.mxu1 %v691_v0 }
  0x52   :  { %488 = vmatpush3.msra.mxu0 %v82_v27  ;;  %523 = vmatpush3.msra.mxu1 %v175_v32 }
  0x53   :  { %489 = vmatprep.subr.mxu0 %v691_v0  ;;  %524 = vmatprep.subr.mxu1 %v691_v0 }
  0x54   :  { %490 = vmatpush3.msra.mxu0 %v81_v29  ;;  %525 = vmatpush3.msra.mxu1 %v174_v33 }
  0x55   :  { %492 = vmatmul.mubr.f32.vlgmr.msra.gmra.mxu0 %v80_v30  ;;  %529 = vmatprep.subr.mxu0 %v691_v0 }
  0x56   :  { %561 = vmatprep.mubr.msk.f32.mxu0 %vm692_vm0, %v691_v0  ;;  %530 = vmatpush3.msra.mxu0 %v283_v34 }
  0x57   :  { %531 = vmatprep.subr.mxu0 %v691_v0  ;;  %576 = vset.pattern.permute.xlu0 %v693_v59 }
  0x58   :  { %532 = vmatpush3.msra.mxu0 %v282_v35 }
  0x59   :  { %533 = vmatprep.subr.mxu0 %v691_v0 }
  0x5a   :  { %534 = vmatpush3.msra.mxu0 %v281_v36 }
  0x5b   :  { %535 = vmatprep.subr.mxu0 %v691_v0 }
  0x5c   :  { %536 = vmatpush3.msra.mxu0 %v280_v37 }
  0x5d   :  { %537 = vmatprep.subr.mxu0 %v691_v0 }
  0x5e   :  { %538 = vmatpush3.msra.mxu0 %v279_v38 }
  0x5f   :  { %539 = vmatprep.subr.mxu0 %v691_v0 }
  0x60   :  { %540 = vmatpush3.msra.mxu0 %v278_v39 }
  0x61   :  { %541 = vmatprep.subr.mxu0 %v691_v0 }
  0x62   :  { %542 = vmatpush3.msra.mxu0 %v277_v40 }
  0x63   :  { %543 = vmatprep.subr.mxu0 %v691_v0 }
  0x64   :  { %544 = vmatpush3.msra.mxu0 %v276_v41 }
  0x65   :  { %545 = vmatprep.subr.mxu0 %v691_v0 }
  0x66   :  { %546 = vmatpush3.msra.mxu0 %v275_v42 }
  0x67   :  { %547 = vmatprep.subr.mxu0 %v691_v0 }
  0x68   :  { %548 = vmatpush3.msra.mxu0 %v274_v43 }
  0x69   :  { %549 = vmatprep.subr.mxu0 %v691_v0 }
  0x6a   :  { %550 = vmatpush3.msra.mxu0 %v273_v44 }
  0x6b   :  { %551 = vmatprep.subr.mxu0 %v691_v0 }
  0x6c   :  { %552 = vmatpush3.msra.mxu0 %v272_v45 }
  0x6d   :  { %553 = vmatprep.subr.mxu0 %v691_v0 }
  0x6e   :  { %554 = vmatpush3.msra.mxu0 %v271_v46 }
  0x6f   :  { %555 = vmatprep.subr.mxu0 %v691_v0 }
  0x70   :  { %556 = vmatpush3.msra.mxu0 %v270_v51 }
  0x71   :  { %557 = vmatprep.subr.mxu0 %v691_v0 }
  0x72   :  { %558 = vmatpush3.msra.mxu0 %v269_v52 }
  0x73   :  { %559 = vmatprep.subr.mxu0 %v691_v0 }
  0x74   :  { %560 = vmatpush3.msra.mxu0 %v268_v53 }
 0x115   :  { %v170_v48 = vpop.f32.mrf.mxu0 }
 0x116   :  { %v171_v49 = vadd.f32 %v405_v47, %v170_v48 }
 0x117   :  { %v493_v50 = vpop.f32.mrf.mxu0 }
 0x118   :  { %527 = vmatmul.mubr.f32.vlgmr.msra.gmra.mxu1 %v171_v49 }
 0x1d8   :  { %v263_v55 = vpop.f32.mrf.mxu1 }
 0x1d9   :  { %v264_v56 = vadd.f32 %v406_v54, %v263_v55 }
 0x1da   :  { %v528_v57 = vpop.f32.mrf.mxu1 }
 0x1db   :  { %v267_v58 = vmax.f32 %v264_v56, 0.0 }
 0x1dd   :  { %562 = vmatmul.mubr.f32.vlgmr.msra.gmra.mxu0 %v267_v58 }
 0x29d   :  { %v357_v0 = vpop.f32.mrf.mxu0 }
 0x29e   :  { %v358_v1 = vadd.f32 %v407_v63, %v357_v0 }
 0x29f   :  { %v563_v2 = vpop.f32.mrf.mxu0 }
 0x2a0   :  { %v368_v3 = vsel %vm367_vm3, %v358_v1, 0.0 }
 0x2a1   :  { %369 = vadd.xlane.f32.xlu0 %v368_v3 }
 0x2b7   :  { %383 = vperm.xlu0 %576, %v358_v1  }
 0x32a   :  { %v370_v4 = vpop.xlane.xlu0 %369 }
 0x32b   :  { %v371_v5 = vrot.slane %v370_v4, 4 }
 0x32d   :  { %v372_v6 = vadd.f32 %v371_v5, %v370_v4 }
 0x32f   :  { %v373_v7 = vrot.slane %v372_v6, 2 }
 0x331   :  { %v374_v8 = vadd.f32 %v373_v7, %v372_v6 }
 0x332   :  { %v384_v13 = vpop.permute.xlu0 %383 }
 0x333   :  { %v375_v9 = vrot.slane %v374_v8, 1 }
 0x335   :  { %v376_v10 = vadd.f32 %v375_v9, %v374_v8 }
 0x337   :  { %564 = vpush %v376_v10 }
 0x368   :  { %s565_s4 = spop %564 }
 0x369   :  { %s378_s24 = smul.f32 0.125, %s565_s4 }
 0x36b   :  { %v379_v11 = vstv %s378_s24 }
 0x36c   :  { %v380_v12 = vsub.f32 %v358_v1, %v379_v11 }
 0x36e   :  { %v386_v14 = vadd.f32 %v384_v13, %v380_v12 }
 0x370   :  { %387 = vst [vmem:[#allocation10] sm:$0xff] %v386_v14 }
 0x371   :  { %668 = shalt.err (!%p665_p10)
}
 0x372   :  { %397 = dma.vmem_to_hbm [thread:$0]  %s395_s6, 128, %s829_s7, [#allocation4]  }
 0x373   :  { %683 = dma.done.wait [#allocation4], 128  }
 0x374   :  { %684 = vsyncadd [#allocation4], 4294967168 }
 0x375   :  { %401 = vsyncpa [#allocation3], 1 }
 0x376   :  { %402 = vsyncpa [#allocation6], 1 }
 0x377   :  { %403 = vsyncpa [#allocation9], 1 }
 0x378   :  { %404 = vsyncpa [#allocation4], 1 }

</bundles_post_ra>
